<compile_context>
chip_gen: v6e
topology: v6e:2x2x1
jax: 0.10.0
libtpu: 0.0.40
codegen_flags: <defaults>
</compile_context>

<pallas_src>
import functools

import jax
import jax.numpy as jnp
from jax.experimental import pallas as pl
from jax.experimental.pallas import tpu as pltpu

_MIB = 1 << 20
_FUSED_VMEM_BUDGET = 28 * _MIB   # estimated footprint cap for the fused path
_FUSED_VMEM_LIMIT = 48 * _MIB    # scoped-VMEM limit (safe: v7x 64 MiB physical)
_TWO_PASS_VMEM_LIMIT = 32 * _MIB
_BLOCK_TARGET_BYTES = 2 * _MIB   # per-block target (in x dtype) for the fallback


def _cdiv(a, b):
    return -(-a // b)


# ---------------------------------------------------------------------------
# Fused path (one HBM read, one HBM write): grid over channel tiles only.
# ---------------------------------------------------------------------------
def _bn_fused_nchw_kernel(x_ref, gamma_ref, beta_ref, o_ref, *, inv_count, eps):
    x = x_ref[...].astype(jnp.float32)                                # (N, ct, L)
    s = jnp.sum(jnp.sum(x, axis=2, keepdims=True), axis=0, keepdims=True)      # (1, ct, 1)
    sq = jnp.sum(jnp.sum(x * x, axis=2, keepdims=True), axis=0, keepdims=True)  # (1, ct, 1)
    mean = s * inv_count
    var = sq * inv_count - mean * mean
    inv_std = jax.lax.rsqrt(var + eps)
    scale = gamma_ref[...] * inv_std                                   # (1, ct, 1)
    shift = beta_ref[...] - mean * scale
    o_ref[...] = (x * scale + shift).astype(o_ref.dtype)


def _bn_fused_nc_kernel(x_ref, gamma_ref, beta_ref, o_ref, *, inv_count, eps):
    x = x_ref[...].astype(jnp.float32)                                 # (N, ct)
    s = jnp.sum(x, axis=0, keepdims=True)                              # (1, ct)
    sq = jnp.sum(x * x, axis=0, keepdims=True)
    mean = s * inv_count
    var = sq * inv_count - mean * mean
    inv_std = jax.lax.rsqrt(var + eps)
    scale = gamma_ref[...] * inv_std
    shift = beta_ref[...] - mean * scale
    o_ref[...] = (x * scale + shift).astype(o_ref.dtype)


def _fused_ct_4d(N, C, L, itemsize, budget_bytes):
    """Channel tile for the fused 4D path, or None if it cannot fit."""
    per_elem = 4 * itemsize + 12          # 2x in + 2x out (dtype) + ~3 f32 temps

    def fits(ct):
        return N * ct * L * per_elem <= budget_bytes

    # Packed sub-32-bit dtypes want >=16 (bf16) / >=32 (int8) sublanes per tile.
    min_ct = 8 if itemsize >= 4 else (16 if itemsize == 2 else 32)
    # Prefer a channel split (>= 2 grid steps) so v7x's 2 TensorCores both work.
    for ct in (256, 128, 64, 32, 16, 8):
        if ct < min_ct:
            break
        if ct < C and fits(ct):
            return ct
    if fits(C):
        return C                           # full-dim channel block (always legal)
    return None


def _fused_ct_2d(N, C, itemsize, budget_bytes):
    per_elem = 4 * itemsize + 12

    def fits(ct):
        return N * ct * per_elem <= budget_bytes

    for ct in (512, 384, 256, 128):        # lane-axis tiles: multiples of 128
        if ct < C and fits(ct):
            return ct
    if fits(C):
        return C                           # full-dim block (legal for any C)
    return None


def _bn_nchw_fused(x3, gamma, beta, eps, ct):
    N, C, L = x3.shape
    isz = jnp.dtype(x3.dtype).itemsize
    n_ct = _cdiv(C, ct)
    g3 = gamma.reshape(1, C, 1).astype(jnp.float32)
    b3 = beta.reshape(1, C, 1).astype(jnp.float32)
    kernel = functools.partial(_bn_fused_nchw_kernel,
                               inv_count=1.0 / float(N * L), eps=float(eps))
    return pl.pallas_call(
        kernel,
        out_shape=jax.ShapeDtypeStruct((N, C, L), x3.dtype),
        grid_spec=pltpu.PrefetchScalarGridSpec(
            num_scalar_prefetch=0,
            grid=(n_ct,),
            in_specs=[
                pl.BlockSpec((N, ct, L), lambda ci: (0, ci, 0)),
                pl.BlockSpec((1, ct, 1), lambda ci: (0, ci, 0)),
                pl.BlockSpec((1, ct, 1), lambda ci: (0, ci, 0)),
            ],
            out_specs=pl.BlockSpec((N, ct, L), lambda ci: (0, ci, 0)),
        ),
        compiler_params=pltpu.CompilerParams(
            dimension_semantics=("parallel",),
            vmem_limit_bytes=_FUSED_VMEM_LIMIT),
        cost_estimate=pl.CostEstimate(
            flops=int(8 * N * C * L),
            transcendentals=int(C),
            bytes_accessed=int(2 * N * C * L * isz)),
    )(x3, g3, b3)


def _bn_nc_fused(x, gamma, beta, eps, ct):
    N, C = x.shape
    isz = jnp.dtype(x.dtype).itemsize
    n_ct = _cdiv(C, ct)
    g2 = gamma.reshape(1, C).astype(jnp.float32)
    b2 = beta.reshape(1, C).astype(jnp.float32)
    kernel = functools.partial(_bn_fused_nc_kernel,
                               inv_count=1.0 / float(N), eps=float(eps))
    return pl.pallas_call(
        kernel,
        out_shape=jax.ShapeDtypeStruct((N, C), x.dtype),
        grid_spec=pltpu.PrefetchScalarGridSpec(
            num_scalar_prefetch=0,
            grid=(n_ct,),
            in_specs=[
                pl.BlockSpec((N, ct), lambda ci: (0, ci)),
                pl.BlockSpec((1, ct), lambda ci: (0, ci)),
                pl.BlockSpec((1, ct), lambda ci: (0, ci)),
            ],
            out_specs=pl.BlockSpec((N, ct), lambda ci: (0, ci)),
        ),
        compiler_params=pltpu.CompilerParams(
            dimension_semantics=("parallel",),
            vmem_limit_bytes=_FUSED_VMEM_LIMIT),
        cost_estimate=pl.CostEstimate(
            flops=int(8 * N * C),
            transcendentals=int(C),
            bytes_accessed=int(2 * N * C * isz)),
    )(x, g2, b2)


# ---------------------------------------------------------------------------
# Two-pass fallback, 4D: x viewed as (N, C, L), L = H*W
# ---------------------------------------------------------------------------
def _bn_stats_nchw_kernel(x_ref, gamma_ref, beta_ref, scale_ref, shift_ref,
                          sum_ref, sumsq_ref, *, inv_count, eps, L, lt, mask_l):
    ni = pl.program_id(1)
    li = pl.program_id(2)

    @pl.when((ni == 0) & (li == 0))
    def _():
        sum_ref[...] = jnp.zeros_like(sum_ref)
        sumsq_ref[...] = jnp.zeros_like(sumsq_ref)

    x = x_ref[0].astype(jnp.float32)                       # (ct, lt)
    if mask_l:
        lanes = jax.lax.broadcasted_iota(jnp.int32, x.shape, 1)
        x = jnp.where(lanes < (L - li * lt), x, 0.0)       # zero the padded tail
    sum_ref[...] += jnp.sum(x, axis=1, keepdims=True)      # (ct, 1)
    sumsq_ref[...] += jnp.sum(x * x, axis=1, keepdims=True)

    @pl.when((ni == pl.num_programs(1) - 1) & (li == pl.num_programs(2) - 1))
    def _():
        mean = sum_ref[...] * inv_count                    # (ct, 1)
        var = sumsq_ref[...] * inv_count - mean * mean     # biased variance
        inv_std = jax.lax.rsqrt(var + eps)
        scale = gamma_ref[...] * inv_std
        scale_ref[...] = scale
        shift_ref[...] = beta_ref[...] - mean * scale


def _bn_norm_nchw_kernel(x_ref, scale_ref, shift_ref, o_ref):
    x = x_ref[0].astype(jnp.float32)                       # (ct, lt)
    o_ref[0] = (x * scale_ref[...] + shift_ref[...]).astype(o_ref.dtype)


def _choose_lt(L, ct, itemsize, target_bytes=_BLOCK_TARGET_BYTES):
    """Lane-axis tile: ~target_bytes per block, multiple of 128, or full L."""
    if L <= 1024:
        return L                                           # full dim (legal)
    lt = (target_bytes // (ct * itemsize)) // 128 * 128
    lt = max(128, min(lt, 8192))
    lt = min(lt, _cdiv(L, 128) * 128)                      # don't overshoot L much
    return lt


def _bn_nchw_two_pass(x3, gamma, beta, eps):
    N, C, L = x3.shape
    isz = jnp.dtype(x3.dtype).itemsize
    ct = C if C <= 256 else 256                            # multiple of 8 or full C
    lt = _choose_lt(L, ct, isz)
    n_ct, n_lt = _cdiv(C, ct), _cdiv(L, lt)
    mask_l = (L % lt) != 0

    gamma2 = gamma.reshape(C, 1).astype(jnp.float32)
    beta2 = beta.reshape(C, 1).astype(jnp.float32)

    stats_kernel = functools.partial(
        _bn_stats_nchw_kernel, inv_count=1.0 / float(N * L), eps=float(eps),
        L=L, lt=lt, mask_l=mask_l)
    scale, shift = pl.pallas_call(
        stats_kernel,
        out_shape=(jax.ShapeDtypeStruct((C, 1), jnp.float32),
                   jax.ShapeDtypeStruct((C, 1), jnp.float32)),
        grid_spec=pltpu.PrefetchScalarGridSpec(
            num_scalar_prefetch=0,
            grid=(n_ct, N, n_lt),
            in_specs=[
                pl.BlockSpec((1, ct, lt), lambda ci, ni, li: (ni, ci, li)),
                pl.BlockSpec((ct, 1), lambda ci, ni, li: (ci, 0)),
                pl.BlockSpec((ct, 1), lambda ci, ni, li: (ci, 0)),
            ],
            out_specs=[
                pl.BlockSpec((ct, 1), lambda ci, ni, li: (ci, 0)),
                pl.BlockSpec((ct, 1), lambda ci, ni, li: (ci, 0)),
            ],
            scratch_shapes=[pltpu.VMEM((ct, 1), jnp.float32),
                            pltpu.VMEM((ct, 1), jnp.float32)],
        ),
        compiler_params=pltpu.CompilerParams(
            dimension_semantics=("parallel", "arbitrary", "arbitrary"),
            vmem_limit_bytes=_TWO_PASS_VMEM_LIMIT),
        cost_estimate=pl.CostEstimate(
            flops=int(3 * N * C * L), transcendentals=int(C),
            bytes_accessed=int(N * C * L * isz)),
    )(x3, gamma2, beta2)

    y3 = pl.pallas_call(
        _bn_norm_nchw_kernel,
        out_shape=jax.ShapeDtypeStruct((N, C, L), x3.dtype),
        grid_spec=pltpu.PrefetchScalarGridSpec(
            num_scalar_prefetch=0,
            grid=(n_ct, N, n_lt),
            in_specs=[
                pl.BlockSpec((1, ct, lt), lambda ci, ni, li: (ni, ci, li)),
                pl.BlockSpec((ct, 1), lambda ci, ni, li: (ci, 0)),
                pl.BlockSpec((ct, 1), lambda ci, ni, li: (ci, 0)),
            ],
            out_specs=pl.BlockSpec((1, ct, lt), lambda ci, ni, li: (ni, ci, li)),
        ),
        compiler_params=pltpu.CompilerParams(
            # Pure elementwise: every axis is parallel (lets v7x shard all of it).
            dimension_semantics=("parallel", "parallel", "parallel"),
            vmem_limit_bytes=_TWO_PASS_VMEM_LIMIT),
        cost_estimate=pl.CostEstimate(
            flops=int(2 * N * C * L), transcendentals=0,
            bytes_accessed=int(2 * N * C * L * isz)),
    )(x3, scale, shift)
    return y3


# ---------------------------------------------------------------------------
# Two-pass fallback, 2D: x is (N, C), C on lanes, reduce over N
# ---------------------------------------------------------------------------
def _bn_stats_nc_kernel(x_ref, gamma_ref, beta_ref, scale_ref, shift_ref,
                        sum_ref, sumsq_ref, *, inv_count, eps, N, nt, mask_n):
    ni = pl.program_id(1)

    @pl.when(ni == 0)
    def _():
        sum_ref[...] = jnp.zeros_like(sum_ref)
        sumsq_ref[...] = jnp.zeros_like(sumsq_ref)

    x = x_ref[...].astype(jnp.float32)                     # (nt, ct)
    if mask_n:
        rows = jax.lax.broadcasted_iota(jnp.int32, x.shape, 0)
        x = jnp.where(rows < (N - ni * nt), x, 0.0)
    sum_ref[...] += jnp.sum(x, axis=0, keepdims=True)      # (1, ct)
    sumsq_ref[...] += jnp.sum(x * x, axis=0, keepdims=True)

    @pl.when(ni == pl.num_programs(1) - 1)
    def _():
        mean = sum_ref[...] * inv_count
        var = sumsq_ref[...] * inv_count - mean * mean
        inv_std = jax.lax.rsqrt(var + eps)
        scale = gamma_ref[...] * inv_std
        scale_ref[...] = scale
        shift_ref[...] = beta_ref[...] - mean * scale


def _bn_norm_nc_kernel(x_ref, scale_ref, shift_ref, o_ref):
    x = x_ref[...].astype(jnp.float32)                     # (nt, ct)
    o_ref[...] = (x * scale_ref[...] + shift_ref[...]).astype(o_ref.dtype)


def _bn_nc_two_pass(x, gamma, beta, eps):
    # TODO(synk): for C << 128, a (N/k, k*C) reshape would restore lane density.
    N, C = x.shape
    isz = jnp.dtype(x.dtype).itemsize
    ct = C if C <= 512 else 512                            # multiple of 128 or full C
    if N * ct * isz <= _BLOCK_TARGET_BYTES:
        nt = N                                             # full dim (legal)
    else:
        nt = max(8, (_BLOCK_TARGET_BYTES // (ct * isz)) // 8 * 8)
    n_ct, n_nt = _cdiv(C, ct), _cdiv(N, nt)
    mask_n = (N % nt) != 0

    gamma2 = gamma.reshape(1, C).astype(jnp.float32)
    beta2 = beta.reshape(1, C).astype(jnp.float32)

    stats_kernel = functools.partial(
        _bn_stats_nc_kernel, inv_count=1.0 / float(N), eps=float(eps),
        N=N, nt=nt, mask_n=mask_n)
    scale, shift = pl.pallas_call(
        stats_kernel,
        out_shape=(jax.ShapeDtypeStruct((1, C), jnp.float32),
                   jax.ShapeDtypeStruct((1, C), jnp.float32)),
        grid_spec=pltpu.PrefetchScalarGridSpec(
            num_scalar_prefetch=0,
            grid=(n_ct, n_nt),
            in_specs=[
                pl.BlockSpec((nt, ct), lambda ci, ni: (ni, ci)),
                pl.BlockSpec((1, ct), lambda ci, ni: (0, ci)),
                pl.BlockSpec((1, ct), lambda ci, ni: (0, ci)),
            ],
            out_specs=[
                pl.BlockSpec((1, ct), lambda ci, ni: (0, ci)),
                pl.BlockSpec((1, ct), lambda ci, ni: (0, ci)),
            ],
            scratch_shapes=[pltpu.VMEM((1, ct), jnp.float32),
                            pltpu.VMEM((1, ct), jnp.float32)],
        ),
        compiler_params=pltpu.CompilerParams(
            dimension_semantics=("parallel", "arbitrary"),
            vmem_limit_bytes=_TWO_PASS_VMEM_LIMIT),
        cost_estimate=pl.CostEstimate(
            flops=int(3 * N * C), transcendentals=int(C),
            bytes_accessed=int(N * C * isz)),
    )(x, gamma2, beta2)

    y = pl.pallas_call(
        _bn_norm_nc_kernel,
        out_shape=jax.ShapeDtypeStruct((N, C), x.dtype),
        grid_spec=pltpu.PrefetchScalarGridSpec(
            num_scalar_prefetch=0,
            grid=(n_ct, n_nt),
            in_specs=[
                pl.BlockSpec((nt, ct), lambda ci, ni: (ni, ci)),
                pl.BlockSpec((1, ct), lambda ci, ni: (0, ci)),
                pl.BlockSpec((1, ct), lambda ci, ni: (0, ci)),
            ],
            out_specs=pl.BlockSpec((nt, ct), lambda ci, ni: (ni, ci)),
        ),
        compiler_params=pltpu.CompilerParams(
            dimension_semantics=("parallel", "parallel"),
            vmem_limit_bytes=_TWO_PASS_VMEM_LIMIT),
        cost_estimate=pl.CostEstimate(
            flops=int(2 * N * C), transcendentals=0,
            bytes_accessed=int(2 * N * C * isz)),
    )(x, scale, shift)
    return y


# ---------------------------------------------------------------------------
# Public forward (matches myBN.BatchNorm.forward in training mode)
# ---------------------------------------------------------------------------
def batch_norm_forward(x, gamma, beta, eps=1e-5, force_two_pass=False):
    """x: (N, C) or (N, C, H, W) (PyTorch NCHW convention)."""
    assert x.ndim in (2, 4)
    if x.ndim == 2:
        N, C = x.shape
        isz = jnp.dtype(x.dtype).itemsize
        ct = None if force_two_pass else _fused_ct_2d(N, C, isz, _FUSED_VMEM_BUDGET)
        if ct is not None:
            return _bn_nc_fused(x, gamma, beta, eps, ct)
        return _bn_nc_two_pass(x, gamma, beta, eps)

    N, C, H, W = x.shape
    L = H * W
    x3 = x.reshape(N, C, L)                 # contiguous reshape: no data movement
    isz = jnp.dtype(x.dtype).itemsize
    ct = None if force_two_pass else _fused_ct_4d(N, C, L, isz, _FUSED_VMEM_BUDGET)
    if ct is not None:
        y3 = _bn_nchw_fused(x3, gamma, beta, eps, ct)
    else:
        y3 = _bn_nchw_two_pass(x3, gamma, beta, eps)
    return y3.reshape(N, C, H, W)


if __name__ == "__main__":
    key = jax.random.PRNGKey(0)
    kx, kg, kx2, kx3 = jax.random.split(key, 4)

    def ref_bn_4d(x, gamma, beta, eps):
        mean = jnp.mean(x, axis=(0, 2, 3), keepdims=True)
        var = jnp.mean((x - mean) ** 2, axis=(0, 2, 3), keepdims=True)
        C = x.shape[1]
        return (gamma.reshape(1, C, 1, 1) * (x - mean) / jnp.sqrt(var + eps)
                + beta.reshape(1, C, 1, 1))

    def ref_bn_2d(x, gamma, beta, eps):
        mean = jnp.mean(x, axis=0, keepdims=True)
        var = jnp.mean((x - mean) ** 2, axis=0, keepdims=True)
        return gamma.reshape(1, -1) * (x - mean) / jnp.sqrt(var + eps) + beta.reshape(1, -1)

    # ----- 4D NCHW: fused single-read path -------------------------------
    N, C, H, W = 2, 4, 16, 16
    x = jax.random.normal(kx, (N, C, H, W), dtype=jnp.float32)
    gamma = jax.random.uniform(kg, (C,), dtype=jnp.float32)   # reset_parameters(): U[0,1)
    beta = jnp.zeros((C,), dtype=jnp.float32)
    y = jax.block_until_ready(batch_norm_forward(x, gamma, beta, eps=1e-5))
    assert jnp.max(jnp.abs(y - ref_bn_4d(x, gamma, beta, 1e-5))) < 1e-4, "4D fused mismatch"

    # ----- 4D NCHW: forced two-pass fallback ------------------------------
    y_tp = jax.block_until_ready(
        batch_norm_forward(x, gamma, beta, eps=1e-5, force_two_pass=True))
    assert jnp.max(jnp.abs(y_tp - ref_bn_4d(x, gamma, beta, 1e-5))) < 1e-4, "4D 2-pass mismatch"

    # ----- 4D NCHW: forced two-pass with a masked (non-x128) spatial tail --
    N3, C3, H3, W3 = 2, 8, 40, 40
    x3 = jax.random.normal(kx3, (N3, C3, H3, W3), dtype=jnp.float32)
    g3 = jax.random.uniform(kg, (C3,), dtype=jnp.float32)
    b3 = jnp.zeros((C3,), dtype=jnp.float32)
    y3 = jax.block_until_ready(
        batch_norm_forward(x3, g3, b3, eps=1e-5, force_two_pass=True))
    assert jnp.max(jnp.abs(y3 - ref_bn_4d(x3, g3, b3, 1e-5))) < 1e-4, "4D masked-tail mismatch"

    # ----- 2D (N, C): fused and two-pass -----------------------------------
    N2, C2 = 8, 32
    x2 = jax.random.normal(kx2, (N2, C2), dtype=jnp.float32)
    g2 = jax.random.uniform(kg, (C2,), dtype=jnp.float32)
    b2 = jnp.zeros((C2,), dtype=jnp.float32)
    y2 = jax.block_until_ready(batch_norm_forward(x2, g2, b2, eps=1e-5))
    assert jnp.max(jnp.abs(y2 - ref_bn_2d(x2, g2, b2, 1e-5))) < 1e-4, "2D fused mismatch"
    y2_tp = jax.block_until_ready(
        batch_norm_forward(x2, g2, b2, eps=1e-5, force_two_pass=True))
    assert jnp.max(jnp.abs(y2_tp - ref_bn_2d(x2, g2, b2, 1e-5))) < 1e-4, "2D 2-pass mismatch"

    print("KERNEL_OK")
</pallas_src>

<mosaic_0001>
module attributes {stable_mosaic.version = 11 : i64} {
  func.func @_bn_fused_nchw_kernel(%arg0: i32, %arg1: memref<2x4x256xf32, #tpu.memory_space<vmem>>, %arg2: memref<1x4x1xf32, #tpu.memory_space<vmem>>, %arg3: memref<1x4x1xf32, #tpu.memory_space<vmem>>, %arg4: memref<2x4x256xf32, #tpu.memory_space<vmem>>) attributes {dimension_semantics = [#tpu.dimension_semantics<parallel>], iteration_bounds = array<i64: 1>, scalar_prefetch = 0 : i64, scratch_operands = 0 : i64, tpu.core_type = #tpu.core_type<tc>, window_params = [{transform_indices = @transform_0, window_bounds = array<i64: 2, 4, 256>}, {transform_indices = @transform_1, window_bounds = array<i64: 1, 4, 1>}, {transform_indices = @transform_2, window_bounds = array<i64: 1, 4, 1>}, {transform_indices = @transform_3, window_bounds = array<i64: 2, 4, 256>}]} {
    %c0 = arith.constant 0 : index
    %c0_0 = arith.constant 0 : index
    %c0_1 = arith.constant 0 : index
    %0 = vector.load %arg1[%c0, %c0_0, %c0_1] : memref<2x4x256xf32, #tpu.memory_space<vmem>>, vector<2x4x256xf32>
    %cst = arith.constant dense<0.000000e+00> : vector<2x4xf32>
    %1 = vector.multi_reduction <add>, %0, %cst [2] : vector<2x4x256xf32> to vector<2x4xf32>
    %2 = vector.shape_cast %1 : vector<2x4xf32> to vector<2x4x1xf32>
    %cst_2 = arith.constant dense<0.000000e+00> : vector<4x1xf32>
    %3 = vector.multi_reduction <add>, %2, %cst_2 [0] : vector<2x4x1xf32> to vector<4x1xf32>
    %4 = vector.shape_cast %3 : vector<4x1xf32> to vector<1x4x1xf32>
    %5 = arith.mulf %0, %0 : vector<2x4x256xf32>
    %cst_3 = arith.constant dense<0.000000e+00> : vector<2x4xf32>
    %6 = vector.multi_reduction <add>, %5, %cst_3 [2] : vector<2x4x256xf32> to vector<2x4xf32>
    %7 = vector.shape_cast %6 : vector<2x4xf32> to vector<2x4x1xf32>
    %cst_4 = arith.constant dense<0.000000e+00> : vector<4x1xf32>
    %8 = vector.multi_reduction <add>, %7, %cst_4 [0] : vector<2x4x1xf32> to vector<4x1xf32>
    %9 = vector.shape_cast %8 : vector<4x1xf32> to vector<1x4x1xf32>
    %cst_5 = arith.constant 0.001953125 : f32
    %10 = vector.broadcast %cst_5 : f32 to vector<1x4x1xf32>
    %11 = arith.mulf %4, %10 : vector<1x4x1xf32>
    %cst_6 = arith.constant 0.001953125 : f32
    %12 = vector.broadcast %cst_6 : f32 to vector<1x4x1xf32>
    %13 = arith.mulf %9, %12 : vector<1x4x1xf32>
    %14 = arith.mulf %11, %11 : vector<1x4x1xf32>
    %15 = arith.subf %13, %14 : vector<1x4x1xf32>
    %cst_7 = arith.constant 9.99999974E-6 : f32
    %16 = vector.broadcast %cst_7 : f32 to vector<1x4x1xf32>
    %17 = arith.addf %15, %16 : vector<1x4x1xf32>
    %18 = math.rsqrt %17 : vector<1x4x1xf32>
    %c0_8 = arith.constant 0 : index
    %c0_9 = arith.constant 0 : index
    %c0_10 = arith.constant 0 : index
    %19 = vector.load %arg2[%c0_8, %c0_9, %c0_10] : memref<1x4x1xf32, #tpu.memory_space<vmem>>, vector<1x4x1xf32>
    %20 = arith.mulf %19, %18 : vector<1x4x1xf32>
    %c0_11 = arith.constant 0 : index
    %c0_12 = arith.constant 0 : index
    %c0_13 = arith.constant 0 : index
    %21 = vector.load %arg3[%c0_11, %c0_12, %c0_13] : memref<1x4x1xf32, #tpu.memory_space<vmem>>, vector<1x4x1xf32>
    %22 = arith.mulf %11, %20 : vector<1x4x1xf32>
    %23 = arith.subf %21, %22 : vector<1x4x1xf32>
    %24 = vector.broadcast %20 : vector<1x4x1xf32> to vector<2x4x256xf32>
    %25 = arith.mulf %0, %24 : vector<2x4x256xf32>
    %26 = vector.broadcast %23 : vector<1x4x1xf32> to vector<2x4x256xf32>
    %27 = arith.addf %25, %26 : vector<2x4x256xf32>
    %c0_14 = arith.constant 0 : index
    %c0_15 = arith.constant 0 : index
    %c0_16 = arith.constant 0 : index
    %28 = vector.load %arg4[%c0_14, %c0_15, %c0_16] : memref<2x4x256xf32, #tpu.memory_space<vmem>>, vector<2x4x256xf32>
    tpu.vector_store %arg4[%c0_14, %c0_15, %c0_16], %27 {strides = array<i32>} : memref<2x4x256xf32, #tpu.memory_space<vmem>>, vector<2x4x256xf32>,
    return
  }
  func.func @transform_0(%arg0: i32) -> (i32, i32, i32) {
    %c0_i32 = arith.constant 0 : i32
    %c0_i32_0 = arith.constant 0 : i32
    %c0_i32_1 = arith.constant 0 : i32
    return %c0_i32, %arg0, %c0_i32_0 : i32, i32, i32
  }
  func.func @transform_1(%arg0: i32) -> (i32, i32, i32) {
    %c0_i32 = arith.constant 0 : i32
    %c0_i32_0 = arith.constant 0 : i32
    %c0_i32_1 = arith.constant 0 : i32
    return %c0_i32, %arg0, %c0_i32_0 : i32, i32, i32
  }
  func.func @transform_2(%arg0: i32) -> (i32, i32, i32) {
    %c0_i32 = arith.constant 0 : i32
    %c0_i32_0 = arith.constant 0 : i32
    %c0_i32_1 = arith.constant 0 : i32
    return %c0_i32, %arg0, %c0_i32_0 : i32, i32, i32
  }
  func.func @transform_3(%arg0: i32) -> (i32, i32, i32) {
    %c0_i32 = arith.constant 0 : i32
    %c0_i32_0 = arith.constant 0 : i32
    %c0_i32_1 = arith.constant 0 : i32
    return %c0_i32, %arg0, %c0_i32_0 : i32, i32, i32
  }
}

</mosaic_0001>

<bundles_post_ra>
// kernel: tpu_custom_call.1
= control target key start
LH: loop header
LB: loop body
LE: loop exit
PB: predicated region body
PF: predicated region fallthrough
CT: control target
= control target key end

     0   :  { %8 = vsyncpa [#allocation3], 0  ;;  %s242_s0 = inlined_call_operand.hbm [shape: f32[2,4,256], index: 0, kind: input, shape index: {}]   ;;  %s243_s1 = inlined_call_operand.vmem [shape: f32[1,4,1], index: 1, kind: input, shape index: {}]   ;;  %s244_s2 = inlined_call_operand.vmem [shape: f32[1,4,1], index: 2, kind: input, shape index: {}]   ;;  %s245_s3 = inlined_call_operand.hbm [shape: f32[2,4,256], index: 3, kind: output, shape index: {}]  }
   0x1   :  { %9 = vsyncpa [#allocation4], 0  ;;  %s186_s12 = smov [#allocation2]  }
   0x2   :  { %s15_s13 = sshll.u32 %s186_s12, 4  ;;  %s16_s13 = int_to_ptr.vmem [resolvable:$true] %s15_s13 }
   0x3   :  { %s150_s14 = scalar_lea.vmem %s16_s13, 256  ;;  %p155_p1 = scmp.lt.s32.totalorder %s16_s13, %s16_s13 }
   0x4   :  { %p151_p0 = scmp.ne.s32.totalorder %s16_s13, %s150_s14  ;;  %p156_p2 = scmp.lt.s32.totalorder %s150_s14, %s150_s14 }
   0x6   :  { %p157_p3 = por %p156_p2, %p155_p1 }
   0x8   :  { %p158_p4 = pnand %p157_p3, %p151_p0 }
   0xa   :  { %161 = shalt.err (!%p158_p4)
}
   0xb   :  { %s187_s15 = smov 128   ;;  %s188_s16 = smov 8  }
   0xc   :  { %21 = dma.hbm_to_vmem [thread:$0]  %s242_s0, 256, %s16_s13, [#allocation3], %s187_s15, %s187_s15, %s188_s16  }
   0xd   :  { %182 = dma.done.wait [#allocation3], 256  }
   0xe   :  { %183 = vsyncadd [#allocation3], 4294967040  ;;  %vm37_vm0 = vcmask 1043456   ;;  %v29_v0 = vld [vmem:[#allocation2] sm:$0xff]  ;;  %v30_v1 = vld [vmem:[#allocation2 + $0x8] sm:$0xff]  ;;  %v189_v20 = vmov 0   ;;  %v90_v44 = vlaneseq }
   0xf   :  { %v33_v2 = vcombine.high %v29_v0, %v29_v0  ;;  %v38_v3 = vsel %vm37_vm0, %v29_v0, 0.0  ;;  %v51_v4 = vmul.f32 %v29_v0, %v29_v0  ;;  %v34_v5 = vcombine.high %v30_v1, %v30_v1  ;;  %136 = vset.pattern.permute.xlu0 %v189_v20  ;;  %137 = vset.pattern.permute.xlu1 %v189_v20  ;;  %v78_v36 = vld [vmem:[%s243_s1] sm:$0xf]  ;;  %s191_s1 = smov [#allocation5]  }
  0x10   :  { %v43_v6 = vsel %vm37_vm0, %v30_v1, 0.0  ;;  %v52_v7 = vmul.f32 %v30_v1, %v30_v1  ;;  %v80_v39 = vld [vmem:[%s244_s2] sm:$0xf]  ;;  %v190_v42 = vmov 839922192   ;;  %v91_v46 = vshrl.u32 %v90_v44, 7 }
  0x11   :  { %v39_v8 = vsel %vm37_vm0, %v33_v2, 0.0  ;;  %v55_v9 = vcombine.high %v51_v4, %v51_v4  ;;  %v59_v10 = vsel %vm37_vm0, %v51_v4, 0.0  ;;  %v44_v11 = vsel %vm37_vm0, %v34_v5, 0.0  ;;  %s118_s22 = sshll.u32 %s191_s1, 4  ;;  %s119_s22 = int_to_ptr.vmem [resolvable:$true] %s118_s22 }
  0x12   :  { %v40_v12 = vadd.f32 %v39_v8, %v38_v3  ;;  %v56_v13 = vcombine.high %v52_v7, %v52_v7  ;;  %v64_v15 = vsel %vm37_vm0, %v52_v7, 0.0  ;;  %v45_v17 = vadd.f32 %v44_v11, %v43_v6  ;;  %s162_s2 = scalar_lea.vmem %s119_s22, 256  ;;  %p167_p6 = scmp.lt.s32.totalorder %s119_s22, %s119_s22 }
  0x13   :  { %v60_v14 = vsel %vm37_vm0, %v55_v9, 0.0  ;;  %v88_v43 = vunpack.c.l.s4 %v190_v42  ;;  %p163_p5 = scmp.ne.s32.totalorder %s119_s22, %s162_s2  ;;  %p168_p7 = scmp.lt.s32.totalorder %s162_s2, %s162_s2 }
  0x14   :  { %41 = vadd.xlane.f32.xlu0 %v40_v12  ;;  %v61_v16 = vadd.f32 %v60_v14, %v59_v10  ;;  %v65_v18 = vsel %vm37_vm0, %v56_v13, 0.0 }
  0x15   :  { %v66_v19 = vadd.f32 %v65_v18, %v64_v15  ;;  %v89_v45 = vunpack.c.0.s8 %v88_v43  ;;  %p169_p8 = por %p168_p7, %p167_p6 }
  0x16   :  { %62 = vadd.xlane.f32.xlu1 %v61_v16 }
  0x17   :  { %v92_v47 = vsub.s32 %v89_v45, %v91_v46  ;;  %p170_p9 = pnand %p169_p8, %p163_p5 }
  0x18   :  { %46 = vadd.xlane.f32.xlu0 %v45_v17 }
  0x1a   :  { %67 = vadd.xlane.f32.xlu1 %v66_v19 }
  0x9d   :  { %v42_v21 = vpop.xlane.xlu0 %41 }
  0x9e   :  { %v48_v24 = vsel %vm37_vm0, %v42_v21, 0.0 }
  0x9f   :  { %v63_v22 = vpop.xlane.xlu1 %62 }
  0xa0   :  { %v69_v28 = vsel %vm37_vm0, %v63_v22, 0.0 }
  0xa1   :  { %v47_v23 = vpop.xlane.xlu0 %46 }
  0xa2   :  { %v49_v25 = vsel %vm37_vm0, %v47_v23, 0.0 }
  0xa3   :  { %v50_v26 = vadd.f32 %v49_v25, %v48_v24  ;;  %v68_v27 = vpop.xlane.xlu1 %67 }
  0xa4   :  { %v70_v29 = vsel %vm37_vm0, %v68_v27, 0.0 }
  0xa5   :  { %v72_v30 = vmul.f32 0.001953125, %v50_v26  ;;  %v71_v31 = vadd.f32 %v70_v29, %v69_v28 }
  0xa7   :  { %v74_v32 = vmul.f32 %v72_v30, %v72_v30  ;;  %v73_v33 = vmul.f32 0.001953125, %v71_v31 }
  0xa9   :  { %v75_v34 = vsub.f32 %v73_v33, %v74_v32 }
  0xab   :  { %v76_v35 = vadd.f32 1e-05, %v75_v34 }
  0xad   :  { %140 = vrsqrt.f32 %v76_v35 }
  0xba   :  { %v141_v37 = vpop.eup %140 }
  0xbb   :  { %v79_v38 = vmul.f32 %v141_v37, %v78_v36 }
  0xbd   :  { %85 = vperm.xlu0 %136, %v79_v38   ;;  %v81_v40 = vmul.f32 %v79_v38, %v72_v30 }
  0xbf   :  { %v82_v41 = vsub.f32 %v80_v39, %v81_v40 }
  0xc1   :  { %99 = vperm.xlu1 %137, %v82_v41  }
 0x138   :  { %v86_v48 = vpop.permute.xlu0 %85 }
 0x139   :  { %v93_v49 = vrot.slane %v86_v48, %v92_v47 }
 0x13b   :  { %v95_v51 = vmul.f32 %v93_v49, %v29_v0  ;;  %v96_v52 = vmul.f32 %v93_v49, %v30_v1 }
 0x13c   :  { %v100_v50 = vpop.permute.xlu1 %99 }
 0x13d   :  { %v107_v53 = vrot.slane %v100_v50, %v92_v47 }
 0x13f   :  { %v109_v54 = vadd.f32 %v107_v53, %v95_v51  ;;  %v110_v55 = vadd.f32 %v107_v53, %v96_v52 }
 0x141   :  { %111 = vst [vmem:[#allocation5] sm:$0xff] %v109_v54  ;;  %112 = vst [vmem:[#allocation5 + $0x8] sm:$0xff] %v110_v55 }
 0x142   :  { %173 = shalt.err (!%p170_p9)
}
 0x143   :  { %124 = dma.vmem_to_hbm [thread:$0]  %s119_s22, 256, %s245_s3, [#allocation4], %s187_s15, %s187_s15, %s188_s16  }
 0x144   :  { %184 = dma.done.wait [#allocation4], 256  }
 0x145   :  { %185 = vsyncadd [#allocation4], 4294967040 }
 0x146   :  { %128 = vsyncpa [#allocation3], 1 }
 0x147   :  { %129 = vsyncpa [#allocation4], 1 }

</bundles_post_ra>
